<compile_context>
chip_gen: v7x
topology: tpu7x:2x2x1
jax: 0.10.0
libtpu: 0.0.40
codegen_flags: <defaults>
</compile_context>

<pallas_src>
import jax
import jax.numpy as jnp
from jax.experimental import pallas as pl
from jax.experimental.pallas import tpu as pltpu

N, P, H, G = 8, 32, 16, 8          # batch, output_dim, hidden width, quadrature grid size
assert N == G                      # the fused data+marginal hidden layer shares its 8 rows
F32 = jnp.float32
_VMEM = pl.BlockSpec(memory_space=pltpu.MemorySpace.VMEM)

LN = 128                           # lane width
D_HID = 6 * H                      # 96  data-path hidden width (6 MLP blocks)
M_HID = 3 * H                      # 48  marginal hidden width (z1, z2, c blocks)
C_HID = 3 * H                      # 48  cross hidden width (cz1, cz2, z1z2 blocks)
INT_W = 3 * P                      # 96  packed integral lane width

# W_slab row offsets: fused second layer | cross second layer | cross first layer
W2F_OFF, W2C_OFF, W1C_OFF, W_ROWS = 0, 2 * LN, 3 * LN, 3 * LN + 8
# misc slab rows
R_BIAS2, R_B1C, R_B2C, R_NOISE, R_LAM0 = 0, 1, 2, 3, 4


def _sum2d(x):
    return jnp.sum(jnp.sum(x, axis=1, keepdims=True), axis=0, keepdims=True)


def nd_fused_kernel(Y_ref, x_ref, W1_ref, W_ref, Xc_ref, misc_ref, out_ref):
    W1 = W1_ref[...]                       # (8, 256): rows 0:3 data W1, row 3 combined b1, rows 4:7 marginal W1
    x = x_ref[...]                         # (N, 3)   data inputs (z1, z2, c)
    Xc = Xc_ref[...]                       # (G*G, 8) cross grid (cols 0:4) + marginal grid (rows 0:G, cols 4:7)

    # ---- combined data/marginal hidden layer: 6 VPU FMAs on one 256-wide tile, one tanh ----
    pre = W1[3:4, :]                                            # combined first-layer bias row
    for k in range(3):
        pre = pre + x[:, k:k + 1] * W1[k:k + 1, :]              # data blocks -> lanes 0:96
        pre = pre + Xc[0:G, 4 + k:5 + k] * W1[4 + k:5 + k, :]   # marginal blocks -> lanes 128:176
    h = jnp.tanh(pre)                                           # (8, 256); padding lanes are tanh(0)=0

    # ---- fused data + marginal second layer: one (8,256)@(256,128) MXU matmul ----
    fused = (jnp.dot(h, W_ref[W2F_OFF:W2F_OFF + 2 * LN, :], preferred_element_type=F32)
             + misc_ref[R_BIAS2:R_BIAS2 + 1, :])                # lanes 0:96 marginal outputs, 96:128 y_pred
    y = fused[:, INT_W:LN]                                      # (N, P)

    # ---- Gaussian NLL ----
    # TODO(synk): the ND decoder class was not shipped with this module; loglik/penalty
    # below follow the original NeuralDec reference code (softplus noise, Gaussian NLL).
    sigma = jax.nn.softplus(misc_ref[R_NOISE:R_NOISE + 1, 0:P])
    resid = (Y_ref[...] - y) / sigma
    nll = _sum2d(0.5 * jnp.log(2.0 * jnp.pi) + jnp.log(sigma) + 0.5 * resid * resid)

    # ---- cross (pairwise) path entirely on the MXU ----
    prec = (jnp.dot(Xc, W_ref[W1C_OFF:W1C_OFF + 8, :], preferred_element_type=F32)
            + misc_ref[R_B1C:R_B1C + 1, :])                     # (G*G, 128)
    hc = jnp.tanh(prec)                                         # lanes >= 48 are tanh(0) = 0
    out_c = (jnp.dot(hc, W_ref[W2C_OFF:W2C_OFF + LN, :], preferred_element_type=F32)
             + misc_ref[R_B2C:R_B2C + 1, :])                    # (G*G, 128); lanes 96:128 = 0

    # ---- quadrature averaging: ONE (2G, G*G)@(G*G, 128) matmul for slow + fast integrals ----
    int_both = jnp.dot(misc_ref[G:3 * G, 0:G * G], out_c, preferred_element_type=F32)   # (16, 128)

    # ---- marginal integrals: mean over the G grid rows of the fused result ----
    colmean = jnp.mean(fused, axis=0, keepdims=True)            # (1, 128); lanes 0:96 = int_m
    row_g = jax.lax.broadcasted_iota(jnp.int32, (G, LN), 0)
    col_g = jax.lax.broadcasted_iota(jnp.int32, (G, LN), 1)
    tail = jnp.where(jnp.logical_and(row_g == 0, col_g < INT_W), colmean, 0.0)           # (8, 128)
    ints = jnp.concatenate([int_both, tail], axis=0)            # (24, 128); rows 17.. are zero

    # ---- augmented-Lagrangian penalty: one elementwise pass + one reduction ----
    Lam = misc_ref[3 * G:6 * G, :]                              # (24, 128), same layout/padding as ints
    lam0 = misc_ref[R_LAM0:R_LAM0 + 1, :]                       # lambda0 broadcast across all lanes
    pen = _sum2d(Lam * ints + 0.5 * lam0 * (ints * ints))
    total = nll + pen                                           # (1, 1)

    # ---- single lane-dense unmasked store: rows 0:16 slow/fast, 16 marginals, 17 loss ----
    rows = jax.lax.broadcasted_iota(jnp.int32, (3 * G, LN), 0)
    out_ref[...] = ints + jnp.where(rows == 2 * G + 1, total, 0.0)


def init_params(key):
    keys = jax.random.split(key, 16)

    def init_mlp(k, in_dim):
        k1, k2, k3, k4 = jax.random.split(k, 4)
        W1 = jax.random.normal(k1, (in_dim, H), F32) / jnp.sqrt(float(in_dim))
        b1 = 0.1 * jax.random.normal(k3, (1, H), F32)
        W2 = jax.random.normal(k2, (H, P), F32) / jnp.sqrt(float(H))
        b2 = 0.1 * jax.random.normal(k4, (1, P), F32)
        return (W1, b1, W2, b2)

    # mapping order: z1, z2, c, cz1 (input [c,z1]), cz2 (input [c,z2]), z1z2 (input [z1,z2])
    in_dims = (1, 1, 1, 2, 2, 2)
    mlps = [init_mlp(keys[i], d) for i, d in enumerate(in_dims)]
    (W1_z1, b1_z1, W2_z1, b2_z1) = mlps[0]
    (W1_z2, b1_z2, W2_z2, b2_z2) = mlps[1]
    (W1_c,  b1_c,  W2_c,  b2_c) = mlps[2]
    (W1_cz1, b1_cz1, W2_cz1, b2_cz1) = mlps[3]
    (W1_cz2, b1_cz2, W2_cz2, b2_cz2) = mlps[4]
    (W1_zz,  b1_zz,  W2_zz,  b2_zz) = mlps[5]

    intercept = 0.1 * jax.random.normal(keys[6], (1, P), F32)
    noise_sd = -1.0 * jnp.ones((1, P), F32)        # raw; sigma = softplus(raw)
    lambda0 = jnp.ones((1, 1), F32)
    lam_shapes = [(1, P)] * 3 + [(G, P)] * 6
    # Lambda order: z1, z2, c, cz1_dc, cz1_dz1, cz2_dc, cz2_dz2, z1z2_dz1, z1z2_dz2
    lams = [0.01 * jax.random.normal(keys[7 + i], s, F32) for i, s in enumerate(lam_shapes)]

    grid_z1 = jnp.linspace(-2.0, 2.0, G, dtype=F32).reshape(G, 1)
    grid_z2 = jnp.linspace(-2.0, 2.0, G, dtype=F32).reshape(G, 1)
    grid_c = jnp.linspace(0.0, 1.0, G, dtype=F32).reshape(G, 1)

    Z1H = jnp.zeros((1, H), F32)
    # data-path first layer (3, 6H); rows (z1, z2, c); col blocks z1, z2, c, cz1, cz2, z1z2
    W1_big = jnp.concatenate([
        jnp.concatenate([W1_z1[0:1], Z1H, Z1H, W1_cz1[1:2], Z1H, W1_zz[0:1]], axis=1),
        jnp.concatenate([Z1H, W1_z2[0:1], Z1H, Z1H, W1_cz2[1:2], W1_zz[1:2]], axis=1),
        jnp.concatenate([Z1H, Z1H, W1_c[0:1], W1_cz1[0:1], W1_cz2[0:1], Z1H], axis=1),
    ], axis=0)                                                                  # (3, 96)
    b1_big = jnp.concatenate([b1_z1, b1_z2, b1_c, b1_cz1, b1_cz2, b1_zz], axis=1)     # (1, 96)
    W2_big = jnp.concatenate([W2_z1, W2_z2, W2_c, W2_cz1, W2_cz2, W2_zz], axis=0)     # (96, 32)
    out_bias = intercept + b2_z1 + b2_z2 + b2_c + b2_cz1 + b2_cz2 + b2_zz             # (1, 32)

    # marginal path (z1, z2, c blocks)
    W1_marg = W1_big[:, 0:M_HID]                                                # (3, 48) block-diag
    b1_marg = b1_big[:, 0:M_HID]
    ZHP = jnp.zeros((H, P), F32)
    W2_marg_bd = jnp.concatenate([
        jnp.concatenate([W2_z1, ZHP, ZHP], axis=1),
        jnp.concatenate([ZHP, W2_z2, ZHP], axis=1),
        jnp.concatenate([ZHP, ZHP, W2_c], axis=1)], axis=0)                     # (48, 96)
    b2_marg_cat = jnp.concatenate([b2_z1, b2_z2, b2_c], axis=1)                 # (1, 96)

    # cross path: input rows (c_slow, z1_fast, z2_fast, z1_slow); col blocks cz1, cz2, z1z2
    W1_cross4 = jnp.concatenate([
        jnp.concatenate([W1_cz1[0:1], W1_cz2[0:1], Z1H], axis=1),
        jnp.concatenate([W1_cz1[1:2], Z1H, Z1H], axis=1),
        jnp.concatenate([Z1H, W1_cz2[1:2], W1_zz[1:2]], axis=1),
        jnp.concatenate([Z1H, Z1H, W1_zz[0:1]], axis=1)], axis=0)               # (4, 48)
    b1_cross = jnp.concatenate([b1_cz1, b1_cz2, b1_zz], axis=1)                 # (1, 48)
    W2_cross_bd = jnp.concatenate([
        jnp.concatenate([W2_cz1, ZHP, ZHP], axis=1),
        jnp.concatenate([ZHP, W2_cz2, ZHP], axis=1),
        jnp.concatenate([ZHP, ZHP, W2_zz], axis=1)], axis=0)                    # (48, 96)
    b2_cross_cat = jnp.concatenate([b2_cz1, b2_cz2, b2_zz], axis=1)             # (1, 96)

    # grid-derived constants (hoisted out of the per-step forward)
    X_marg = jnp.concatenate([grid_z1, grid_z2, grid_c], axis=1)                # (G, 3)
    c_slow = jnp.repeat(grid_c, G, axis=0)
    z1_fast = jnp.tile(grid_z1, (G, 1))
    z2_fast = jnp.tile(grid_z2, (G, 1))
    z1_slow = jnp.repeat(grid_z1, G, axis=0)
    X_cross4 = jnp.concatenate([c_slow, z1_fast, z2_fast, z1_slow], axis=1)     # (G*G, 4)

    r = jnp.arange(G * G)
    a_slow = (r[None, :] % G == jnp.arange(G)[:, None]).astype(F32) / G         # avg over slow var
    a_fast = (r[None, :] // G == jnp.arange(G)[:, None]).astype(F32) / G        # avg over fast var
    A_quad = jnp.concatenate([a_slow, a_fast], axis=0)                          # (2G, G*G)

    # ---------------- lane-dense packed kernel slabs ----------------
    # W1 slab (8, 256): rows 0:3 data first layer (lanes 0:96); row 3 combined first-layer bias
    # (data lanes 0:96, marginal lanes 128:176); rows 4:7 marginal first layer (lanes 128:176).
    W1_slab = jnp.zeros((8, 2 * LN), F32)
    W1_slab = W1_slab.at[0:3, 0:D_HID].set(W1_big)
    W1_slab = W1_slab.at[3:4, 0:D_HID].set(b1_big)
    W1_slab = W1_slab.at[3:4, LN:LN + M_HID].set(b1_marg)
    W1_slab = W1_slab.at[4:7, LN:LN + M_HID].set(W1_marg)

    # W slab (392, 128): rows 0:256 fused block-diag second layer (data -> lanes 96:128,
    # marginal -> lanes 0:96), rows 256:384 cross second layer, rows 384:392 cross first layer.
    W2f = jnp.zeros((2 * LN, LN), F32)
    W2f = W2f.at[0:D_HID, INT_W:LN].set(W2_big)
    W2f = W2f.at[LN:LN + M_HID, 0:INT_W].set(W2_marg_bd)
    W2c = jnp.zeros((LN, LN), F32)
    W2c = W2c.at[0:C_HID, 0:INT_W].set(W2_cross_bd)
    W1c = jnp.zeros((8, LN), F32)
    W1c = W1c.at[0:4, 0:C_HID].set(W1_cross4)
    W_slab = jnp.concatenate([W2f, W2c, W1c], axis=0)                           # (392, 128)

    # cross-grid slab (G*G, 8): cols 0:4 cross inputs; rows 0:G, cols 4:7 carry the marginal grid
    # (those columns hit zero rows of W1c, so they do not perturb the cross matmul).
    Xc_slab = jnp.zeros((G * G, 8), F32)
    Xc_slab = Xc_slab.at[:, 0:4].set(X_cross4)
    Xc_slab = Xc_slab.at[0:G, 4:7].set(X_marg)

    # misc slab (48, 128): bias/noise/lambda0 rows, averaging matrix, packed Lambdas
    Lam_slow = jnp.concatenate([lams[3], lams[5], lams[7]], axis=1)             # (G, 96)
    Lam_fast = jnp.concatenate([lams[4], lams[6], lams[8]], axis=1)             # (G, 96)
    Lam_marg = jnp.concatenate([lams[0], lams[1], lams[2]], axis=1)             # (1, 96)
    misc = jnp.zeros((6 * G, LN), F32)
    misc = misc.at[R_BIAS2:R_BIAS2 + 1, 0:INT_W].set(b2_marg_cat)
    misc = misc.at[R_BIAS2:R_BIAS2 + 1, INT_W:LN].set(out_bias)
    misc = misc.at[R_B1C:R_B1C + 1, 0:C_HID].set(b1_cross)
    misc = misc.at[R_B2C:R_B2C + 1, 0:INT_W].set(b2_cross_cat)
    misc = misc.at[R_NOISE:R_NOISE + 1, 0:P].set(noise_sd)
    misc = misc.at[R_LAM0:R_LAM0 + 1, :].set(lambda0[0, 0])
    misc = misc.at[G:3 * G, 0:G * G].set(A_quad)
    misc = misc.at[3 * G:4 * G, 0:INT_W].set(Lam_slow)
    misc = misc.at[4 * G:5 * G, 0:INT_W].set(Lam_fast)
    misc = misc.at[5 * G:5 * G + 1, 0:INT_W].set(Lam_marg)

    params = dict(W1_slab=W1_slab, W_slab=W_slab, Xc_slab=Xc_slab, misc_slab=misc)
    raw = dict(mlps=mlps, intercept=intercept, noise_sd=noise_sd,
               grid_z1=grid_z1, grid_z2=grid_z2, grid_c=grid_c,
               Lambdas=lams, lambda0=lambda0)
    return params, raw


@jax.jit
def cvae_with_fixed_z_forward(params, Y, c, z):
    """Equivalent of CVAE_with_fixed_z.forward((Y, c, z))."""
    x = jnp.concatenate([z, c], axis=1)    # (N, 3), columns (z1, z2, c)

    slab = pl.pallas_call(
        nd_fused_kernel,
        out_shape=jax.ShapeDtypeStruct((3 * G, LN), F32),
        in_specs=[_VMEM] * 6,
        out_specs=_VMEM,
    )(Y, x, params['W1_slab'], params['W_slab'], params['Xc_slab'], params['misc_slab'])

    total_loss = slab[2 * G + 1, 0]
    slow = slab[0:G, 0:INT_W]
    fast = slab[G:2 * G, 0:INT_W]
    marg = slab[2 * G:2 * G + 1, 0:INT_W]
    int_z1, int_z2, int_c = marg[:, 0:P], marg[:, P:2 * P], marg[:, 2 * P:3 * P]
    int_cz1_dc, int_cz2_dc, int_z1z2_dz1 = slow[:, 0:P], slow[:, P:2 * P], slow[:, 2 * P:3 * P]
    int_cz1_dz1, int_cz2_dz2, int_z1z2_dz2 = fast[:, 0:P], fast[:, P:2 * P], fast[:, 2 * P:3 * P]
    return (total_loss, int_z1, int_z2, int_c, int_cz1_dc, int_cz1_dz1,
            int_cz2_dc, int_cz2_dz2, int_z1z2_dz1, int_z1z2_dz2)


def reference_forward(raw, Y, c, z):
    """Pure-JAX reference built from the unpacked per-MLP weights."""
    hp = jax.lax.Precision.HIGHEST

    def mlp(x, p):
        W1, b1, W2, b2 = p
        return jnp.dot(jnp.tanh(jnp.dot(x, W1, precision=hp) + b1), W2, precision=hp) + b2

    z1, z2 = z[:, 0:1], z[:, 1:2]
    m = raw['mlps']
    y = (raw['intercept'] + mlp(z1, m[0]) + mlp(z2, m[1]) + mlp(c, m[2])
         + mlp(jnp.concatenate([c, z1], 1), m[3])
         + mlp(jnp.concatenate([c, z2], 1), m[4])
         + mlp(jnp.concatenate([z1, z2], 1), m[5]))
    sigma = jax.nn.softplus(raw['noise_sd'])
    nll = jnp.sum(0.5 * jnp.log(2.0 * jnp.pi) + jnp.log(sigma) + 0.5 * ((Y - y) / sigma) ** 2)

    gz1, gz2, gc = raw['grid_z1'], raw['grid_z2'], raw['grid_c']

    def cross(a, b):
        return jnp.concatenate([jnp.repeat(a, b.shape[0], axis=0),
                                jnp.tile(b, (a.shape[0], 1))], axis=1)

    int_z1 = jnp.mean(mlp(gz1, m[0]), axis=0, keepdims=True)
    int_z2 = jnp.mean(mlp(gz2, m[1]), axis=0, keepdims=True)
    int_c = jnp.mean(mlp(gc, m[2]), axis=0, keepdims=True)
    o_cz1 = mlp(cross(gc, gz1), m[3]).reshape(G, G, P)
    o_cz2 = mlp(cross(gc, gz2), m[4]).reshape(G, G, P)
    o_zz = mlp(cross(gz1, gz2), m[5]).reshape(G, G, P)
    ints = (int_z1, int_z2, int_c,
            jnp.mean(o_cz1, axis=0), jnp.mean(o_cz1, axis=1),
            jnp.mean(o_cz2, axis=0), jnp.mean(o_cz2, axis=1),
            jnp.mean(o_zz, axis=0), jnp.mean(o_zz, axis=1))
    lam0 = raw['lambda0'][0, 0]
    pen = 0.0
    for lam, ig in zip(raw['Lambdas'], ints):
        pen = pen + jnp.sum(lam * ig) + 0.5 * lam0 * jnp.sum(ig * ig)
    return (nll + pen,) + ints


if __name__ == "__main__":
    key = jax.random.PRNGKey(0)
    kp, kY, kc, kz = jax.random.split(key, 4)
    params, raw = init_params(kp)
    Y = jax.random.normal(kY, (N, P), F32)
    c = jax.random.uniform(kc, (N, 1), F32)
    z = jax.random.normal(kz, (N, 2), F32)

    out = cvae_with_fixed_z_forward(params, Y, c, z)
    out = jax.block_until_ready(out)
    assert len(out) == 10

    ref = reference_forward(raw, Y, c, z)
    for got, want in zip(out, ref):
        assert got.shape == jnp.asarray(want).shape
        assert bool(jnp.allclose(got, want, rtol=1e-3, atol=1e-3))

    print("KERNEL_OK")
</pallas_src>

<mosaic_0001>
module attributes {stable_mosaic.version = 11 : i64} {
  func.func @nd_fused_kernel(%arg0: memref<8x32xf32, #tpu.memory_space<vmem>>, %arg1: memref<8x3xf32, #tpu.memory_space<vmem>>, %arg2: memref<8x256xf32, #tpu.memory_space<vmem>>, %arg3: memref<392x128xf32, #tpu.memory_space<vmem>>, %arg4: memref<64x8xf32, #tpu.memory_space<vmem>>, %arg5: memref<48x128xf32, #tpu.memory_space<vmem>>, %arg6: memref<24x128xf32, #tpu.memory_space<vmem>>) attributes {dimension_semantics = [], scalar_prefetch = 0 : i64, scratch_operands = 0 : i64, tpu.core_type = #tpu.core_type<tc>} {
    %c0 = arith.constant 0 : index
    %c0_0 = arith.constant 0 : index
    %0 = vector.load %arg2[%c0, %c0_0] : memref<8x256xf32, #tpu.memory_space<vmem>>, vector<8x256xf32>
    %c0_1 = arith.constant 0 : index
    %c0_2 = arith.constant 0 : index
    %1 = vector.load %arg1[%c0_1, %c0_2] : memref<8x3xf32, #tpu.memory_space<vmem>>, vector<8x3xf32>
    %c0_3 = arith.constant 0 : index
    %c0_4 = arith.constant 0 : index
    %2 = vector.load %arg4[%c0_3, %c0_4] : memref<64x8xf32, #tpu.memory_space<vmem>>, vector<64x8xf32>
    %3 = vector.extract_strided_slice %0 {offsets = [3, 0], sizes = [1, 256], strides = [1, 1]} : vector<8x256xf32> to vector<1x256xf32>
    %4 = vector.extract_strided_slice %1 {offsets = [0, 0], sizes = [8, 1], strides = [1, 1]} : vector<8x3xf32> to vector<8x1xf32>
    %5 = vector.extract_strided_slice %0 {offsets = [0, 0], sizes = [1, 256], strides = [1, 1]} : vector<8x256xf32> to vector<1x256xf32>
    %6 = vector.broadcast %4 : vector<8x1xf32> to vector<8x256xf32>
    %7 = vector.broadcast %5 : vector<1x256xf32> to vector<8x256xf32>
    %8 = arith.mulf %6, %7 : vector<8x256xf32>
    %9 = vector.broadcast %3 : vector<1x256xf32> to vector<8x256xf32>
    %10 = arith.addf %9, %8 : vector<8x256xf32>
    %11 = vector.extract_strided_slice %2 {offsets = [0, 4], sizes = [8, 1], strides = [1, 1]} : vector<64x8xf32> to vector<8x1xf32>
    %12 = vector.extract_strided_slice %0 {offsets = [4, 0], sizes = [1, 256], strides = [1, 1]} : vector<8x256xf32> to vector<1x256xf32>
    %13 = vector.broadcast %11 : vector<8x1xf32> to vector<8x256xf32>
    %14 = vector.broadcast %12 : vector<1x256xf32> to vector<8x256xf32>
    %15 = arith.mulf %13, %14 : vector<8x256xf32>
    %16 = arith.addf %10, %15 : vector<8x256xf32>
    %17 = vector.extract_strided_slice %1 {offsets = [0, 1], sizes = [8, 1], strides = [1, 1]} : vector<8x3xf32> to vector<8x1xf32>
    %18 = vector.extract_strided_slice %0 {offsets = [1, 0], sizes = [1, 256], strides = [1, 1]} : vector<8x256xf32> to vector<1x256xf32>
    %19 = vector.broadcast %17 : vector<8x1xf32> to vector<8x256xf32>
    %20 = vector.broadcast %18 : vector<1x256xf32> to vector<8x256xf32>
    %21 = arith.mulf %19, %20 : vector<8x256xf32>
    %22 = arith.addf %16, %21 : vector<8x256xf32>
    %23 = vector.extract_strided_slice %2 {offsets = [0, 5], sizes = [8, 1], strides = [1, 1]} : vector<64x8xf32> to vector<8x1xf32>
    %24 = vector.extract_strided_slice %0 {offsets = [5, 0], sizes = [1, 256], strides = [1, 1]} : vector<8x256xf32> to vector<1x256xf32>
    %25 = vector.broadcast %23 : vector<8x1xf32> to vector<8x256xf32>
    %26 = vector.broadcast %24 : vector<1x256xf32> to vector<8x256xf32>
    %27 = arith.mulf %25, %26 : vector<8x256xf32>
    %28 = arith.addf %22, %27 : vector<8x256xf32>
    %29 = vector.extract_strided_slice %1 {offsets = [0, 2], sizes = [8, 1], strides = [1, 1]} : vector<8x3xf32> to vector<8x1xf32>
    %30 = vector.extract_strided_slice %0 {offsets = [2, 0], sizes = [1, 256], strides = [1, 1]} : vector<8x256xf32> to vector<1x256xf32>
    %31 = vector.broadcast %29 : vector<8x1xf32> to vector<8x256xf32>
    %32 = vector.broadcast %30 : vector<1x256xf32> to vector<8x256xf32>
    %33 = arith.mulf %31, %32 : vector<8x256xf32>
    %34 = arith.addf %28, %33 : vector<8x256xf32>
    %35 = vector.extract_strided_slice %2 {offsets = [0, 6], sizes = [8, 1], strides = [1, 1]} : vector<64x8xf32> to vector<8x1xf32>
    %36 = vector.extract_strided_slice %0 {offsets = [6, 0], sizes = [1, 256], strides = [1, 1]} : vector<8x256xf32> to vector<1x256xf32>
    %37 = vector.broadcast %35 : vector<8x1xf32> to vector<8x256xf32>
    %38 = vector.broadcast %36 : vector<1x256xf32> to vector<8x256xf32>
    %39 = arith.mulf %37, %38 : vector<8x256xf32>
    %40 = arith.addf %34, %39 : vector<8x256xf32>
    %41 = math.tanh %40 : vector<8x256xf32>
    %c0_5 = arith.constant 0 : index
    %c0_6 = arith.constant 0 : index
    %42 = vector.load %arg3[%c0_5, %c0_6] : memref<392x128xf32, #tpu.memory_space<vmem>>, vector<256x128xf32>
    %cst = arith.constant dense<0.000000e+00> : vector<8x128xf32>
    %43 = tpu.matmul %41, %42, %cst {dimension_numbers = #tpu.dot_dimension_numbers<[1], [0], [0], [1], [0, 0, 1, 1], [], []>} : vector<8x256xf32>, vector<256x128xf32>, vector<8x128xf32> -> vector<8x128xf32>
    %c0_7 = arith.constant 0 : index
    %c0_8 = arith.constant 0 : index
    %44 = vector.load %arg5[%c0_7, %c0_8] : memref<48x128xf32, #tpu.memory_space<vmem>>, vector<1x128xf32>
    %45 = vector.broadcast %44 : vector<1x128xf32> to vector<8x128xf32>
    %46 = arith.addf %43, %45 : vector<8x128xf32>
    %47 = vector.extract_strided_slice %46 {offsets = [0, 96], sizes = [8, 32], strides = [1, 1]} : vector<8x128xf32> to vector<8x32xf32>
    %c3 = arith.constant 3 : index
    %c0_9 = arith.constant 0 : index
    %48 = vector.load %arg5[%c3, %c0_9] : memref<48x128xf32, #tpu.memory_space<vmem>>, vector<1x32xf32>
    %cst_10 = arith.constant 0.000000e+00 : f32
    %49 = vector.broadcast %cst_10 : f32 to vector<1x32xf32>
    %50 = arith.maximumf %48, %49 : vector<1x32xf32>
    %51 = vector.broadcast %cst_10 : f32 to vector<1x32xf32>
    %52 = arith.subf %48, %51 : vector<1x32xf32>
    %53 = arith.cmpf one, %52, %52 : vector<1x32xf32>
    %54 = vector.broadcast %cst_10 : f32 to vector<1x32xf32>
    %55 = arith.addf %48, %54 : vector<1x32xf32>
    %56 = math.absf %52 : vector<1x32xf32>
    %cst_11 = arith.constant 0.000000e+00 : f32
    %57 = vector.broadcast %cst_11 : f32 to vector<1x32xf32>
    %58 = arith.subf %57, %56 : vector<1x32xf32>
    %59 = math.exp %58 : vector<1x32xf32>
    %60 = math.log1p %59 : vector<1x32xf32>
    %61 = arith.addf %50, %60 : vector<1x32xf32>
    %62 = arith.select %53, %55, %61 : vector<1x32xi1>, vector<1x32xf32>
    %c0_12 = arith.constant 0 : index
    %c0_13 = arith.constant 0 : index
    %63 = vector.load %arg0[%c0_12, %c0_13] : memref<8x32xf32, #tpu.memory_space<vmem>>, vector<8x32xf32>
    %64 = arith.subf %63, %47 : vector<8x32xf32>
    %65 = vector.broadcast %62 : vector<1x32xf32> to vector<8x32xf32>
    %66 = arith.divf %64, %65 : vector<8x32xf32>
    %cst_14 = arith.constant 6.28318548 : f32
    %67 = math.log %cst_14 : f32
    %cst_15 = arith.constant 5.000000e-01 : f32
    %68 = arith.mulf %cst_15, %67 : f32
    %69 = math.log %62 : vector<1x32xf32>
    %70 = vector.broadcast %68 : f32 to vector<1x32xf32>
    %71 = arith.addf %70, %69 : vector<1x32xf32>
    %cst_16 = arith.constant 5.000000e-01 : f32
    %72 = vector.broadcast %cst_16 : f32 to vector<8x32xf32>
    %73 = arith.mulf %72, %66 : vector<8x32xf32>
    %74 = arith.mulf %73, %66 : vector<8x32xf32>
    %75 = vector.broadcast %71 : vector<1x32xf32> to vector<8x32xf32>
    %76 = arith.addf %75, %74 : vector<8x32xf32>
    %cst_17 = arith.constant dense<0.000000e+00> : vector<8xf32>
    %77 = vector.multi_reduction <add>, %76, %cst_17 [1] : vector<8x32xf32> to vector<8xf32>
    %78 = vector.shape_cast %77 : vector<8xf32> to vector<8x1xf32>
    %cst_18 = arith.constant dense<0.000000e+00> : vector<1xf32>
    %79 = vector.multi_reduction <add>, %78, %cst_18 [0] : vector<8x1xf32> to vector<1xf32>
    %80 = vector.shape_cast %79 : vector<1xf32> to vector<1x1xf32>
    %c384 = arith.constant 384 : index
    %c0_19 = arith.constant 0 : index
    %81 = vector.load %arg3[%c384, %c0_19] : memref<392x128xf32, #tpu.memory_space<vmem>>, vector<8x128xf32>
    %cst_20 = arith.constant dense<0.000000e+00> : vector<64x128xf32>
    %82 = tpu.matmul %2, %81, %cst_20 {dimension_numbers = #tpu.dot_dimension_numbers<[1], [0], [0], [1], [0, 0, 1, 1], [], []>} : vector<64x8xf32>, vector<8x128xf32>, vector<64x128xf32> -> vector<64x128xf32>
    %c1 = arith.constant 1 : index
    %c0_21 = arith.constant 0 : index
    %83 = vector.load %arg5[%c1, %c0_21] : memref<48x128xf32, #tpu.memory_space<vmem>>, vector<1x128xf32>
    %84 = vector.broadcast %83 : vector<1x128xf32> to vector<64x128xf32>
    %85 = arith.addf %82, %84 : vector<64x128xf32>
    %86 = math.tanh %85 : vector<64x128xf32>
    %c256 = arith.constant 256 : index
    %c0_22 = arith.constant 0 : index
    %87 = vector.load %arg3[%c256, %c0_22] : memref<392x128xf32, #tpu.memory_space<vmem>>, vector<128x128xf32>
    %cst_23 = arith.constant dense<0.000000e+00> : vector<64x128xf32>
    %88 = tpu.matmul %86, %87, %cst_23 {dimension_numbers = #tpu.dot_dimension_numbers<[1], [0], [0], [1], [0, 0, 1, 1], [], []>} : vector<64x128xf32>, vector<128x128xf32>, vector<64x128xf32> -> vector<64x128xf32>
    %c2 = arith.constant 2 : index
    %c0_24 = arith.constant 0 : index
    %89 = vector.load %arg5[%c2, %c0_24] : memref<48x128xf32, #tpu.memory_space<vmem>>, vector<1x128xf32>
    %90 = vector.broadcast %89 : vector<1x128xf32> to vector<64x128xf32>
    %91 = arith.addf %88, %90 : vector<64x128xf32>
    %c8 = arith.constant 8 : index
    %c0_25 = arith.constant 0 : index
    %92 = vector.load %arg5[%c8, %c0_25] : memref<48x128xf32, #tpu.memory_space<vmem>>, vector<16x64xf32>
    %cst_26 = arith.constant dense<0.000000e+00> : vector<16x128xf32>
    %93 = tpu.matmul %92, %91, %cst_26 {dimension_numbers = #tpu.dot_dimension_numbers<[1], [0], [0], [1], [0, 0, 1, 1], [], []>} : vector<16x64xf32>, vector<64x128xf32>, vector<16x128xf32> -> vector<16x128xf32>
    %cst_27 = arith.constant dense<0.000000e+00> : vector<128xf32>
    %94 = vector.multi_reduction <add>, %46, %cst_27 [0] : vector<8x128xf32> to vector<128xf32>
    %95 = vector.shape_cast %94 : vector<128xf32> to vector<1x128xf32>
    %cst_28 = arith.constant 8.000000e+00 : f32
    %96 = vector.broadcast %cst_28 : f32 to vector<1x128xf32>
    %97 = arith.divf %95, %96 : vector<1x128xf32>
    %98 = tpu.iota {dimensions = array<i32: 0>} : vector<8x128xi32>
    %99 = tpu.iota {dimensions = array<i32: 1>} : vector<8x128xi32>
    %c0_i32 = arith.constant 0 : i32
    %100 = vector.broadcast %c0_i32 : i32 to vector<8x128xi32>
    %101 = arith.cmpi eq, %98, %100 : vector<8x128xi32>
    %c96_i32 = arith.constant 96 : i32
    %102 = vector.broadcast %c96_i32 : i32 to vector<8x128xi32>
    %103 = arith.cmpi slt, %99, %102 : vector<8x128xi32>
    %104 = arith.andi %101, %103 : vector<8x128xi1>
    %cst_29 = arith.constant 0.000000e+00 : f32
    %105 = vector.shape_cast %97 : vector<1x128xf32> to vector<1x128xf32>
    %106 = vector.broadcast %105 : vector<1x128xf32> to vector<8x128xf32>
    %107 = vector.broadcast %cst_29 : f32 to vector<8x128xf32>
    %108 = arith.select %104, %106, %107 : vector<8x128xi1>, vector<8x128xf32>
    %109 = tpu.concatenate %93, %108 in 0 : vector<16x128xf32>, vector<8x128xf32> -> vector<24x128xf32>
    %c24 = arith.constant 24 : index
    %c0_30 = arith.constant 0 : index
    %110 = vector.load %arg5[%c24, %c0_30] : memref<48x128xf32, #tpu.memory_space<vmem>>, vector<24x128xf32>
    %c4 = arith.constant 4 : index
    %c0_31 = arith.constant 0 : index
    %111 = vector.load %arg5[%c4, %c0_31] : memref<48x128xf32, #tpu.memory_space<vmem>>, vector<1x128xf32>
    %112 = arith.mulf %110, %109 : vector<24x128xf32>
    %cst_32 = arith.constant 5.000000e-01 : f32
    %113 = vector.broadcast %cst_32 : f32 to vector<1x128xf32>
    %114 = arith.mulf %113, %111 : vector<1x128xf32>
    %115 = arith.mulf %109, %109 : vector<24x128xf32>
    %116 = vector.broadcast %114 : vector<1x128xf32> to vector<24x128xf32>
    %117 = arith.mulf %116, %115 : vector<24x128xf32>
    %118 = arith.addf %112, %117 : vector<24x128xf32>
    %cst_33 = arith.constant dense<0.000000e+00> : vector<24xf32>
    %119 = vector.multi_reduction <add>, %118, %cst_33 [1] : vector<24x128xf32> to vector<24xf32>
    %120 = vector.shape_cast %119 : vector<24xf32> to vector<24x1xf32>
    %cst_34 = arith.constant dense<0.000000e+00> : vector<1xf32>
    %121 = vector.multi_reduction <add>, %120, %cst_34 [0] : vector<24x1xf32> to vector<1xf32>
    %122 = vector.shape_cast %121 : vector<1xf32> to vector<1x1xf32>
    %123 = arith.addf %80, %122 : vector<1x1xf32>
    %124 = tpu.iota {dimensions = array<i32: 0>} : vector<24x128xi32>
    %c17_i32 = arith.constant 17 : i32
    %125 = vector.broadcast %c17_i32 : i32 to vector<24x128xi32>
    %126 = arith.cmpi eq, %124, %125 : vector<24x128xi32>
    %cst_35 = arith.constant 0.000000e+00 : f32
    %127 = vector.shape_cast %123 : vector<1x1xf32> to vector<1x1xf32>
    %128 = vector.broadcast %127 : vector<1x1xf32> to vector<24x128xf32>
    %129 = vector.broadcast %cst_35 : f32 to vector<24x128xf32>
    %130 = arith.select %126, %128, %129 : vector<24x128xi1>, vector<24x128xf32>
    %131 = arith.addf %109, %130 : vector<24x128xf32>
    %c0_36 = arith.constant 0 : index
    %c0_37 = arith.constant 0 : index
    %132 = vector.load %arg6[%c0_36, %c0_37] : memref<24x128xf32, #tpu.memory_space<vmem>>, vector<24x128xf32>
    tpu.vector_store %arg6[%c0_36, %c0_37], %131 {strides = array<i32>} : memref<24x128xf32, #tpu.memory_space<vmem>>, vector<24x128xf32>,
    return
  }
}

</mosaic_0001>

<bundles_post_ra>
// kernel: cvae_with_fixed_z_forward.1
= control target key start
LH: loop header
LB: loop body
LE: loop exit
PB: predicated region body
PF: predicated region fallthrough
CT: control target
= control target key end

     0   :  { %11 = vsyncpa [#allocation3], 0  ;;  %s1054_s21 = smov [#allocation2]   ;;  %s1216_s0 = inlined_call_operand.vmem [shape: f32[8,32], index: 0, kind: input, shape index: {}]   ;;  %s1217_s1 = inlined_call_operand.vmem [shape: f32[8,3], index: 1, kind: input, shape index: {}]   ;;  %s1218_s2 = inlined_call_operand.vmem [shape: f32[8,256], index: 2, kind: input, shape index: {}]   ;;  %s1219_s3 = inlined_call_operand.hbm [shape: f32[392,128], index: 3, kind: input, shape index: {}]   ;;  %s1220_s4 = inlined_call_operand.vmem [shape: f32[64,8], index: 4, kind: input, shape index: {}]   ;;  %s1221_s5 = inlined_call_operand.vmem [shape: f32[48,128], index: 5, kind: input, shape index: {}]   ;;  %s1222_s6 = inlined_call_operand.vmem [shape: f32[24,128], index: 6, kind: output, shape index: {}]  }
   0x1   :  { %s23_s22 = sshll.u32 %s1054_s21, 4  ;;  %s1030_s25 = scalar_lea.hbm %s1219_s3, 6272  ;;  %s24_s22 = int_to_ptr.vmem [resolvable:$true] %s23_s22 }
   0x2   :  { %p1031_p0 = scmp.ne.s32.totalorder %s1219_s3, %s1030_s25  ;;  %p1034_p1 = scmp.lt.u32.totalorder %s1030_s25, %s1219_s3 }
   0x4   :  { %p1036_p2 = pnand %p1034_p1, %p1031_p0 }
   0x6   :  { %1039 = shalt.err (!%p1036_p2)
}
   0x7   :  { %s1040_s30 = scalar_lea.vmem %s24_s22, 6272  ;;  %p1045_p4 = scmp.lt.s32.totalorder %s24_s22, %s24_s22 }
   0x8   :  { %p1041_p3 = scmp.ne.s32.totalorder %s24_s22, %s1040_s30  ;;  %p1046_p5 = scmp.lt.s32.totalorder %s1040_s30, %s1040_s30 }
   0xa   :  { %p1047_p6 = por %p1046_p5, %p1045_p4 }
   0xc   :  { %p1048_p7 = pnand %p1047_p6, %p1041_p3 }
   0xe   :  { %1051 = shalt.err (!%p1048_p7)
}
   0xf   :  { %s1055_s7 = smov 128   ;;  %s1056_s8 = smov 8  }
  0x10   :  { %29 = dma.hbm_to_vmem [thread:$0]  %s1219_s3, 6272, %s24_s22, [#allocation3], %s1055_s7, %s1055_s7, %s1056_s8  }
  0x11   :  { %1052 = dma.done.wait [#allocation3], 6272  }
  0x12   :  { %1053 = vsyncadd [#allocation3], 4294961024  ;;  %v1057_v0 = vmov 0   ;;  %v1058_v1 = vmov 1   ;;  %vm320_vm0 = vcmask 64512   ;;  %v314_v2 = vld [vmem:[#allocation2 + $0x180] sm:$0xff]  ;;  %v53_v46 = vlaneseq }
  0x13   :  { %996 = vset.pattern.permute.xlu0 %v1057_v0  ;;  %998 = vset.pattern.permute.xlu1 %v1058_v1  ;;  %v40_v3 = vld [vmem:[%s1220_s4] sm:$0xff]  ;;  %v41_v4 = vld [vmem:[%s1220_s4 + $0x8] sm:$0xff]  ;;  %v42_v5 = vld [vmem:[%s1220_s4 + $0x10] sm:$0xff]  ;;  %v1059_v16 = vmov 4   ;;  %v1060_v18 = vmov 5   ;;  %v1061_v22 = vmov 6  }
  0x14   :  { %829 = vmatprep.subr.mxu1 %v314_v2  ;;  %831 = vmatprep.mubr.msk.f32.mxu1 %vm320_vm0, %v40_v3  ;;  %v39_v6 = vld [vmem:[%s1217_s1] sm:$0xff]  ;;  %v458_v8 = vld [vmem:[#allocation2 + $0x108] sm:$0xff]  ;;  %v43_v9 = vld [vmem:[%s1220_s4 + $0x18] sm:$0xff]  ;;  %v1062_v24 = vmov 2   ;;  %v1147_v58 = vshrl.u32 %v53_v46, 7  ;;  %vm585_vm1 = vcmask 523264  }
  0x15   :  { %830 = vmatpush3.msra.mxu1 %v314_v2  ;;  %v457_v7 = vld [vmem:[#allocation2 + $0x100] sm:$0xff]  ;;  %50 = vperm.xlu0 %996, %v39_v6   ;;  %v459_v11 = vld [vmem:[#allocation2 + $0x110] sm:$0xff]  ;;  %v460_v12 = vld [vmem:[#allocation2 + $0x118] sm:$0xff]  ;;  %s1063_s11 = smov 32   ;;  %vm304_vm7 = vcmask 261120  }
  0x16   :  { %832 = vmatmul.mubr.msk.f32.vlgmr.msra.gmra.mrb[0].mxu1 %vm320_vm0, %v41_v4  ;;  %v938_v10 = vpack.c.bf16 %v458_v8, %v457_v7  ;;  %v44_v13 = vld [vmem:[%s1220_s4 + $0x20] sm:$0xff]  ;;  %91 = vperm.xlu1 %998, %v39_v6   ;;  %v942_v14 = vpack.c.bf16 %v460_v12, %v459_v11  ;;  %v45_v15 = vld [vmem:[%s1220_s4 + $0x28] sm:$0xff]  ;;  %v46_v17 = vld [vmem:[%s1220_s4 + $0x30] sm:$0xff]  ;;  %v1150_v1 = vsub.s32 0, %v1147_v58  ;;  %v65_v7 = vsub.s32 3, %v1147_v58 }
  0x17   :  { %834 = vmatprep.mubr.msk.f32.mxu1 %vm320_vm0, %v42_v5  ;;  %v461_v19 = vld [vmem:[#allocation2 + $0x120] sm:$0xff]  ;;  %v462_v20 = vld [vmem:[#allocation2 + $0x128] sm:$0xff]  ;;  %v47_v21 = vld [vmem:[%s1220_s4 + $0x38] sm:$0xff]  ;;  %vm679_vm4 = vcmp.eq.s32.totalorder %v1147_v58, 0 }
  0x18   :  { %939 = vmatprep.subr.bf16.mxu1 %v938_v10  ;;  %v946_v23 = vpack.c.bf16 %v462_v20, %v461_v19  ;;  %v463_v25 = vld [vmem:[#allocation2 + $0x130] sm:$0xff]  ;;  %v464_v26 = vld [vmem:[#allocation2 + $0x138] sm:$0xff]  ;;  %v465_v28 = vld [vmem:[#allocation2 + $0x140] sm:$0xff] }
  0x19   :  { %997 = vset.pattern.permute.xlu0 %v1059_v16  ;;  %941 = vmatpush3.bf16.msra.mxu1 %v938_v10  ;;  %v950_v27 = vpack.c.bf16 %v464_v26, %v463_v25  ;;  %v466_v29 = vld [vmem:[#allocation2 + $0x148] sm:$0xff]  ;;  %v467_v31 = vld [vmem:[#allocation2 + $0x150] sm:$0xff]  ;;  %v468_v32 = vld [vmem:[#allocation2 + $0x158] sm:$0xff]  ;;  %v80_v16 = vsub.s32 4, %v1147_v58 }
  0x1a   :  { %835 = vmatmul.mubr.msk.f32.gmra.mrb[2].mxu1 %vm320_vm0, %v43_v9  ;;  %999 = vset.pattern.permute.xlu1 %v1060_v18  ;;  %v954_v30 = vpack.c.bf16 %v466_v29, %v465_v28  ;;  %v958_v33 = vpack.c.bf16 %v468_v32, %v467_v31  ;;  %v469_v34 = vld [vmem:[#allocation2 + $0x160] sm:$0xff]  ;;  %v470_v35 = vld [vmem:[#allocation2 + $0x168] sm:$0xff]  ;;  %v471_v37 = vld [vmem:[#allocation2 + $0x170] sm:$0xff]  ;;  %v128_v28 = vsub.s32 2, %v1147_v58 }
  0x1b   :  { %837 = vmatprep.mubr.msk.f32.mxu1 %vm320_vm0, %v44_v13  ;;  %75 = vperm.xlu0 %997, %v40_v3   ;;  %v962_v36 = vpack.c.bf16 %v470_v35, %v469_v34  ;;  %v472_v38 = vld [vmem:[#allocation2 + $0x178] sm:$0xff]  ;;  %v172_v40 = vld [vmem:[#allocation2 + $0x80] sm:$0xff]  ;;  %v173_v41 = vld [vmem:[#allocation2 + $0x88] sm:$0xff] }
  0x1c   :  { %107 = vperm.xlu1 %999, %v40_v3   ;;  %943 = vmatprep.subr.bf16.mxu1 %v942_v14  ;;  %v966_v39 = vpack.c.bf16 %v472_v38, %v471_v37  ;;  %v156_v42 = vld [vmem:[#allocation2] sm:$0xff]  ;;  %v906_v43 = vpack.c.bf16 %v173_v41, %v172_v40  ;;  %v157_v44 = vld [vmem:[#allocation2 + $0x8] sm:$0xff]  ;;  %v174_v47 = vld [vmem:[#allocation2 + $0x90] sm:$0xff]  ;;  %v144_v38 = vsub.s32 6, %v1147_v58 }
  0x1d   :  { %945 = vmatpush3.bf16.msra.mxu1 %v942_v14  ;;  %v908_v45 = vpack.c.bf16 %v157_v44, %v156_v42  ;;  %v175_v48 = vld [vmem:[#allocation2 + $0x98] sm:$0xff]  ;;  %v158_v49 = vld [vmem:[#allocation2 + $0x10] sm:$0xff]  ;;  %v176_v52 = vld [vmem:[#allocation2 + $0xa0] sm:$0xff] }
  0x1e   :  { %838 = vmatmul.mubr.msk.f32.gmra.mrb[4].mxu1 %vm320_vm0, %v45_v15  ;;  %947 = vmatprep.subr.bf16.mxu1 %v946_v23  ;;  %v910_v50 = vpack.c.bf16 %v175_v48, %v174_v47  ;;  %v159_v51 = vld [vmem:[#allocation2 + $0x18] sm:$0xff]  ;;  %v177_v53 = vld [vmem:[#allocation2 + $0xa8] sm:$0xff]  ;;  %v160_v56 = vld [vmem:[#allocation2 + $0x20] sm:$0xff]  ;;  %v96_v15 = vsub.s32 1, %v1147_v58 }
  0x1f   :  { %840 = vmatprep.mubr.msk.f32.mxu1 %vm320_vm0, %v46_v17  ;;  %1001 = vset.pattern.permute.xlu0 %v1061_v22  ;;  %v912_v54 = vpack.c.bf16 %v159_v51, %v158_v49  ;;  %v914_v55 = vpack.c.bf16 %v177_v53, %v176_v52  ;;  %v161_v57 = vld [vmem:[#allocation2 + $0x28] sm:$0xff]  ;;  %v178_v59 = vld [vmem:[#allocation2 + $0xb0] sm:$0xff]  ;;  %v179_v60 = vld [vmem:[#allocation2 + $0xb8] sm:$0xff]  ;;  %v112_v17 = vsub.s32 5, %v1147_v58 }
  0x20   :  { %1000 = vset.pattern.permute.xlu1 %v1062_v24  ;;  %139 = vperm.xlu0 %1001, %v40_v3   ;;  %v916_v61 = vpack.c.bf16 %v161_v57, %v160_v56  ;;  %v918_v62 = vpack.c.bf16 %v179_v60, %v178_v59  ;;  %v162_v63 = vld [vmem:[#allocation2 + $0x30] sm:$0xff]  ;;  %v163_v0 = vld [vmem:[#allocation2 + $0x38] sm:$0xff]  ;;  %v180_v2 = vld [vmem:[#allocation2 + $0xc0] sm:$0xff] }
  0x21   :  { %123 = vperm.xlu1 %1000, %v39_v6   ;;  %949 = vmatpush3.bf16.msra.mxu1 %v946_v23  ;;  %v181_v3 = vld [vmem:[#allocation2 + $0xc8] sm:$0xff]  ;;  %v37_v4 = vld [vmem:[%s1218_s2] sm:$0xff]  ;;  %v920_v6 = vpack.c.bf16 %v163_v0, %v162_v63  ;;  %v182_v13 = vld [vmem:[#allocation2 + $0xd0] sm:$0xff] }
  0x22   :  { %841 = vmatmul.mubr.msk.f32.gmra.mrb[6].mxu1 %vm320_vm0, %v47_v21  ;;  %951 = vmatprep.subr.bf16.mxu1 %v950_v27  ;;  %v38_v5 = vld [vmem:[%s1218_s2 + $0x8] sm:$0xff]  ;;  %v922_v8 = vpack.c.bf16 %v181_v3, %v180_v2  ;;  %v164_v9 = vld [vmem:[#allocation2 + $0x40] sm:$0xff]  ;;  %v56_v11 = vrot.slane %v37_v4, %v1150_v1  ;;  %v183_v14 = vld [vmem:[#allocation2 + $0xd8] sm:$0xff]  ;;  %v66_v20 = vrot.slane %v37_v4, %v65_v7 }
  0x23   :  { %907 = vmatprep.subr.bf16.mxu0 %v906_v43  ;;  %v165_v10 = vld [vmem:[#allocation2 + $0x48] sm:$0xff]  ;;  %v60_v12 = vrot.slane %v38_v5, %v1150_v1  ;;  %v70_v21 = vrot.slane %v38_v5, %v65_v7  ;;  %v926_v22 = vpack.c.bf16 %v183_v14, %v182_v13  ;;  %v166_v23 = vld [vmem:[#allocation2 + $0x50] sm:$0xff]  ;;  %v167_v24 = vld [vmem:[#allocation2 + $0x58] sm:$0xff]  ;;  %v97_v31 = vrot.slane %v37_v4, %v96_v15 }
  0x24   :  { %909 = vmatpush3.bf16.msra.mxu0 %v908_v45  ;;  %v924_v18 = vpack.c.bf16 %v165_v10, %v164_v9  ;;  %v184_v29 = vld [vmem:[#allocation2 + $0xe0] sm:$0xff]  ;;  %v101_v32 = vrot.slane %v38_v5, %v96_v15  ;;  %v85_v34 = vrot.slane %v38_v5, %v80_v16  ;;  %v113_v37 = vrot.slane %v37_v4, %v112_v17  ;;  %v186_v44 = vld [vmem:[#allocation2 + $0xf0] sm:$0xff]  ;;  %v187_v45 = vld [vmem:[#allocation2 + $0xf8] sm:$0xff] }
  0x25   :  { %953 = vmatpush3.bf16.msra.mxu1 %v950_v27  ;;  %911 = vmatprep.subr.bf16.mxu0 %v910_v50  ;;  %v168_v35 = vld [vmem:[#allocation2 + $0x60] sm:$0xff]  ;;  %v117_v42 = vrot.slane %v38_v5, %v112_v17  ;;  %v129_v48 = vrot.slane %v37_v4, %v128_v28  ;;  %v145_v56 = vrot.slane %v37_v4, %v144_v38  ;;  %v170_v0 = vld [vmem:[#allocation2 + $0x70] sm:$0xff]  ;;  %v171_v2 = vld [vmem:[#allocation2 + $0x78] sm:$0xff] }
  0x26   :  { %955 = vmatprep.subr.bf16.mxu1 %v954_v30  ;;  %v149_v57 = vrot.slane %v38_v5, %v144_v38  ;;  %v934_v59 = vpack.c.bf16 %v187_v45, %v186_v44  ;;  %v583_v45 = vld [vmem:[%s1221_s5 + $0x8] sm:$0xff] }
  0x28   :  { %913 = vmatpush3.bf16.msra.mxu0 %v912_v54 }
  0x29   :  { %957 = vmatpush3.bf16.msra.mxu1 %v954_v30  ;;  %915 = vmatprep.subr.bf16.mxu0 %v914_v55  ;;  %v185_v30 = vld [vmem:[#allocation2 + $0xe8] sm:$0xff]  ;;  %v133_v55 = vrot.slane %v38_v5, %v128_v28 }
  0x2a   :  { %959 = vmatprep.subr.bf16.mxu1 %v958_v33  ;;  %v930_v43 = vpack.c.bf16 %v185_v30, %v184_v29 }
  0x2c   :  { %917 = vmatpush3.bf16.msra.mxu0 %v916_v61 }
  0x2d   :  { %961 = vmatpush3.bf16.msra.mxu1 %v958_v33  ;;  %919 = vmatprep.subr.bf16.mxu0 %v918_v62  ;;  %v81_v33 = vrot.slane %v37_v4, %v80_v16 }
  0x2e   :  { %963 = vmatprep.subr.bf16.mxu1 %v962_v36 }
  0x30   :  { %921 = vmatpush3.bf16.msra.mxu0 %v920_v6 }
  0x31   :  { %965 = vmatpush3.bf16.msra.mxu1 %v962_v36  ;;  %923 = vmatprep.subr.bf16.mxu0 %v922_v8  ;;  %v169_v36 = vld [vmem:[#allocation2 + $0x68] sm:$0xff] }
  0x32   :  { %967 = vmatprep.subr.bf16.mxu1 %v966_v39  ;;  %v932_v49 = vpack.c.bf16 %v169_v36, %v168_v35 }
  0x34   :  { %925 = vmatpush3.bf16.msra.mxu0 %v924_v18 }
  0x35   :  { %969 = vmatpush3.bf16.msra.mxu1 %v966_v39  ;;  %v928_v39 = vpack.c.bf16 %v167_v24, %v166_v23  ;;  %927 = vmatprep.subr.bf16.mxu0 %v926_v22 }
  0x38   :  { %929 = vmatpush3.bf16.msra.mxu0 %v928_v39 }
  0x39   :  { %931 = vmatprep.subr.bf16.mxu0 %v930_v43 }
  0x3c   :  { %933 = vmatpush3.bf16.msra.mxu0 %v932_v49 }
  0x3d   :  { %935 = vmatprep.subr.bf16.mxu0 %v934_v59 }
  0x94   :  { %v51_v19 = vpop.permute.xlu0 %50 }
  0x95   :  { %v61_v25 = vmul.f32 %v56_v11, %v51_v19  ;;  %v62_v26 = vmul.f32 %v60_v12, %v51_v19  ;;  %v92_v27 = vpop.permute.xlu1 %91  ;;  %v936_v11 = vpack.c.bf16 %v171_v2, %v170_v0 }
  0x96   :  { %v102_v50 = vmul.f32 %v97_v31, %v92_v27  ;;  %v103_v51 = vmul.f32 %v101_v32, %v92_v27 }
  0x97   :  { %v71_v40 = vadd.f32 %v66_v20, %v61_v25  ;;  %v72_v41 = vadd.f32 %v70_v21, %v62_v26  ;;  %937 = vmatpush3.bf16.msra.mxu0 %v936_v11  ;;  %v739_v20 = vld [vmem:[%s1221_s5 + $0x1] ss:$0 sm:$0xff] }
  0x9a   :  { %v76_v47 = vpop.permute.xlu0 %75 }
  0x9b   :  { %v86_v52 = vmul.f32 %v81_v33, %v76_v47  ;;  %v87_v53 = vmul.f32 %v85_v34, %v76_v47  ;;  %v108_v54 = vpop.permute.xlu1 %107 }
  0x9c   :  { %v118_v62 = vmul.f32 %v113_v37, %v108_v54  ;;  %v119_v63 = vmul.f32 %v117_v42, %v108_v54 }
  0x9d   :  { %v88_v60 = vadd.f32 %v86_v52, %v71_v40  ;;  %v89_v61 = vadd.f32 %v87_v53, %v72_v41  ;;  %v748_v52 = vld [vmem:[%s1221_s5 + $0x2] ss:$0 sm:$0xff] }
  0x9f   :  { %v104_v3 = vadd.f32 %v102_v50, %v88_v60  ;;  %v105_v6 = vadd.f32 %v103_v51, %v89_v61  ;;  %v140_v7 = vpop.permute.xlu0 %139 }
  0xa0   :  { %v124_v8 = vpop.permute.xlu1 %123  ;;  %v150_v9 = vmul.f32 %v145_v56, %v140_v7  ;;  %v151_v10 = vmul.f32 %v149_v57, %v140_v7 }
  0xa1   :  { %v120_v12 = vadd.f32 %v118_v62, %v104_v3  ;;  %v121_v4 = vadd.f32 %v119_v63, %v105_v6  ;;  %v134_v5 = vmul.f32 %v129_v48, %v124_v8  ;;  %v135_v13 = vmul.f32 %v133_v55, %v124_v8  ;;  %v738_v48 = vld [vmem:[%s1221_s5] ss:$0 sm:$0xff] }
  0xa3   :  { %v136_v14 = vadd.f32 %v134_v5, %v120_v12  ;;  %v137_v15 = vadd.f32 %v135_v13, %v121_v4  ;;  %v584_v4 = vld [vmem:[%s1221_s5 + $0x10] sm:$0xff]  ;;  %v263_v5 = vld [vmem:[%s1221_s5 + $0x3] sm:$0x1] }
  0xa4   :  { %v267_v13 = vand.u32 2147483647, %v263_v5  ;;  %vm265_vm3 = vcmp.ne.f32.partialorder %v263_v5, %v263_v5 }
  0xa5   :  { %v152_v16 = vadd.f32 %v150_v9, %v136_v14  ;;  %v153_v17 = vadd.f32 %v151_v10, %v137_v15 }
  0xa6   :  { %v268_v14 = vsub.f32 0.0, %v267_v13 }
  0xa7   :  { %1002 = vtanh.f32 %v152_v16 }
  0xa8   :  { %1004 = vtanh.f32 %v153_v17  ;;  %v269_v15 = vmul.f32 1.442695, %v268_v14 }
  0xb1   :  { %v1003_v18 = vpop.eup %1002 }
  0xb2   :  { %v1005_v19 = vpop.eup %1004 }
  0xb3   :  { %257 = vmatprep.mubr.f32.mxu0 %v1005_v19 }
  0xb4   :  { %258 = vmatmul.mubr.f32.vlgmr.msra.gmra.mrb[0].mxu0 %v1003_v18 }
  0xb5   :  { %903 = vmatprep.mubr.msk.f32.mxu0 %vm585_vm1, %v583_v45 }
  0xe9   :  { %v833_v21 = vpop.f32.mrb[0].mxu1 }
  0xea   :  { %v416_v22 = vadd.f32 %v833_v21, %v739_v20  ;;  %v410_v23 = vpop.f32.mrb[1].mxu1 }
  0xeb   :  { %v411_v24 = vadd.f32 %v739_v20, %v410_v23 }
  0xed   :  { %1006 = vtanh.f32 %v411_v24  ;;  %v836_v25 = vpop.f32.mrb[2].mxu1  ;;  %v264_v24 = vmax.f32 %v263_v5, 0.0 }
  0xee   :  { %1008 = vtanh.f32 %v416_v22  ;;  %v426_v26 = vadd.f32 %v836_v25, %v739_v20  ;;  %v420_v27 = vpop.f32.mrb[3].mxu1 }
  0xef   :  { %v421_v28 = vadd.f32 %v739_v20, %v420_v27 }
  0xf1   :  { %1010 = vtanh.f32 %v421_v28  ;;  %v839_v29 = vpop.f32.mrb[4].mxu1 }
  0xf2   :  { %1012 = vtanh.f32 %v426_v26  ;;  %v436_v30 = vadd.f32 %v839_v29, %v739_v20  ;;  %v430_v31 = vpop.f32.mrb[5].mxu1 }
  0xf3   :  { %v431_v32 = vadd.f32 %v739_v20, %v430_v31 }
  0xf5   :  { %1014 = vtanh.f32 %v431_v32  ;;  %v842_v33 = vpop.f32.mrb[6].mxu1 }
  0xf6   :  { %1016 = vtanh.f32 %v436_v30  ;;  %v446_v34 = vadd.f32 %v842_v33, %v739_v20  ;;  %v440_v35 = vpop.f32.mrb[7].mxu1 }
  0xf7   :  { %v1007_v36 = vpop.eup %1006  ;;  %v441_v37 = vadd.f32 %v739_v20, %v440_v35 }
  0xf8   :  { %v1009_v38 = vpop.eup %1008  ;;  %875 = vmatprep.mubr.f32.mxu1 %v1007_v36  ;;  %v678_v36 = vand.u32 127, %v53_v46 }
  0xf9   :  { %1018 = vtanh.f32 %v441_v37  ;;  %876 = vmatmul.mubr.f32.vlgmr.msra.gmra.mrb[8].mxu1 %v1009_v38 }
  0xfa   :  { %1020 = vtanh.f32 %v446_v34  ;;  %v282_v34 = vld [vmem:[%s1216_s0] sm:$0xff]  ;;  %vm680_vm5 = vcmp.lt.s32.totalorder %v678_v36, 96 }
  0xfb   :  { %v1011_v39 = vpop.eup %1010  ;;  %1022 = vpow2.f32 %v269_v15  ;;  %vm681_vm6 = vmand %vm679_vm4, %vm680_vm5 }
  0xfc   :  { %v1013_v40 = vpop.eup %1012  ;;  %878 = vmatprep.mubr.f32.mxu1 %v1011_v39 }
  0xfd   :  { %879 = vmatmul.mubr.f32.gmra.mrb[10].mxu1 %v1013_v40 }
  0xff   :  { %v1015_v41 = vpop.eup %1014 }
 0x100   :  { %v1017_v42 = vpop.eup %1016  ;;  %881 = vmatprep.mubr.f32.mxu1 %v1015_v41  ;;  %v686_v41 = vld [vmem:[%s1221_s5 + $0x4] sm:$0x1] }
 0x101   :  { %882 = vmatmul.mubr.f32.gmra.mrb[12].mxu1 %v1017_v42  ;;  %v690_v45 = vmul.f32 0.5, %v686_v41 }
 0x103   :  { %v1019_v43 = vpop.eup %1018 }
 0x104   :  { %v1021_v44 = vpop.eup %1020  ;;  %884 = vmatprep.mubr.f32.mxu1 %v1019_v43 }
 0x105   :  { %885 = vmatmul.mubr.f32.gmra.mrb[14].mxu1 %v1021_v44  ;;  %v1023_v16 = vpop.eup %1022 }
 0x106   :  { %v271_v17 = vadd.f32 1.0, %v1023_v16  ;;  %v274_v18 = vmul.f32 -0.5, %v1023_v16  ;;  %v277_v21 = vand.u32 2147483647, %v1023_v16 }
 0x108   :  { %1024 = vlog2.f32 %v271_v17  ;;  %v275_v19 = vadd.f32 1.0, %v274_v18  ;;  %vm278_vm2 = vcmp.lt.f32.partialorder %v277_v21, 0.0004427343 }
 0x10a   :  { %v276_v23 = vmul.f32 %v1023_v16, %v275_v19 }
 0x112   :  { %v1025_v20 = vpop.eup %1024 }
 0x113   :  { %v273_v22 = vmul.f32 0.6931472, %v1025_v20 }
 0x115   :  { %v279_v25 = vsel %vm278_vm2, %v276_v23, %v273_v22  ;;  %v720_v22 = vadd.s32 16, %v1147_v58 }
 0x116   :  { %v280_v27 = vadd.f32 %v279_v25, %v264_v24 }
 0x117   :  { %vm723_vm8 = vcmp.eq.s32.totalorder %v720_v22, 17 }
 0x118   :  { %v281_v29 = vsel %vm265_vm3, %v263_v5, %v280_v27 }
 0x119   :  { %v291_v30 = vrot.slane %v281_v29, %v1150_v1 }
 0x11b   :  { %1026 = vrcp.f32 %v291_v30 }
 0x11c   :  { %1028 = vlog2.f32 %v281_v29 }
 0x125   :  { %v1027_v38 = vpop.eup %1026 }
 0x126   :  { %v1029_v40 = vpop.eup %1028 }
 0x127   :  { %v295_v44 = vmul.f32 0.6931472, %v1029_v40 }
 0x187   :  { %v783_v47 = vpop.f32.mrb[0].mxu0 }
 0x188   :  { %v784_v49 = vpop.f32.mrb[1].mxu0 }
 0x189   :  { %v785_v50 = vadd.f32 %v784_v49, %v783_v47  ;;  %v296_v49 = vadd.f32 0.9189385, %v295_v44 }
 0x18b   :  { %v260_v51 = vadd.f32 %v785_v50, %v738_v48  ;;  %v684_v50 = vld [vmem:[%s1221_s5 + $0x20] sm:$0xff] }
 0x18d   :  { %284 = vrot.lane.b32.xlu1 %v260_v51, %s1063_s11  ;;  %v667_v26 = vrot.slane %v260_v51, 4 }
 0x18f   :  { %v668_v28 = vadd.f32 %v667_v26, %v260_v51 }
 0x191   :  { %v669_v31 = vrot.slane %v668_v28, 2 }
 0x193   :  { %v670_v32 = vadd.f32 %v669_v31, %v668_v28 }
 0x195   :  { %v671_v33 = vrot.slane %v670_v32, 1 }
 0x197   :  { %v672_v37 = vadd.f32 %v671_v33, %v670_v32 }
 0x199   :  { %v674_v42 = vmul.f32 0.125, %v672_v37 }
 0x19b   :  { %v682_v47 = vsel %vm681_vm6, %v674_v42, 0.0 }
 0x1cc   :  { %v877_v53 = vpop.f32.mrb[8].mxu1 }
 0x1cd   :  { %v550_v54 = vadd.f32 %v877_v53, %v748_v52  ;;  %v544_v55 = vpop.f32.mrb[9].mxu1  ;;  %v683_v53 = vld [vmem:[%s1221_s5 + $0x18] sm:$0xff] }
 0x1ce   :  { %v545_v56 = vadd.f32 %v748_v52, %v544_v55  ;;  %v693_v55 = vmul.f32 %v682_v47, %v682_v47 }
 0x1d0   :  { %v970_v57 = vpack.c.bf16 %v550_v54, %v545_v56  ;;  %v880_v59 = vpop.f32.mrb[10].mxu1  ;;  %v697_v54 = vrot.slane %v690_v45, %v1150_v1 }
 0x1d1   :  { %v560_v60 = vadd.f32 %v880_v59, %v748_v52  ;;  %v554_v61 = vpop.f32.mrb[11].mxu1 }
 0x1d2   :  { %v555_v62 = vadd.f32 %v748_v52, %v554_v61  ;;  %971 = vmatprep.subr.bf16.mxu0 %v970_v57 }
 0x1d3   :  { %973 = vmatpush3.bf16.msra.mxu0 %v970_v57  ;;  %v685_v57 = vld [vmem:[%s1221_s5 + $0x28] sm:$0xff] }
 0x1d4   :  { %v974_v63 = vpack.c.bf16 %v560_v60, %v555_v62  ;;  %v883_v0 = vpop.f32.mrb[12].mxu1  ;;  %v302_v62 = vrot.slane %v296_v49, %v1150_v1 }
 0x1d5   :  { %v570_v2 = vadd.f32 %v883_v0, %v748_v52  ;;  %v564_v3 = vpop.f32.mrb[13].mxu1 }
 0x1d6   :  { %v565_v6 = vadd.f32 %v748_v52, %v564_v3  ;;  %975 = vmatprep.subr.bf16.mxu0 %v974_v63  ;;  %v689_v3 = vmul.f32 %v685_v57, %v682_v47 }
 0x1d7   :  { %977 = vmatpush3.bf16.msra.mxu0 %v974_v63 }
 0x1d8   :  { %v978_v7 = vpack.c.bf16 %v570_v2, %v565_v6  ;;  %v886_v8 = vpop.f32.mrb[14].mxu1  ;;  %v700_v6 = vmul.f32 %v697_v54, %v693_v55 }
 0x1d9   :  { %v580_v9 = vadd.f32 %v886_v8, %v748_v52  ;;  %v574_v10 = vpop.f32.mrb[15].mxu1 }
 0x1da   :  { %v575_v11 = vadd.f32 %v748_v52, %v574_v10  ;;  %979 = vmatprep.subr.bf16.mxu0 %v978_v7 }
 0x1db   :  { %981 = vmatpush3.bf16.msra.mxu0 %v978_v7 }
 0x1dc   :  { %v982_v12 = vpack.c.bf16 %v580_v9, %v575_v11  ;;  %v703_v9 = vadd.f32 %v700_v6, %v689_v3 }
 0x1de   :  { %983 = vmatprep.subr.bf16.mxu0 %v982_v12 }
 0x1df   :  { %985 = vmatpush3.bf16.msra.mxu0 %v982_v12 }
 0x1e2   :  { %904 = vmatmul.mubr.msk.f32.vlgmr.msra.gmra.mrb[2].mxu0 %vm585_vm1, %v584_v4 }
 0x1ff   :  { %v285_v35 = vpop.permute.xlu1 %284 }
 0x200   :  { %v287_v39 = vsub.f32 %v282_v34, %v285_v35 }
 0x202   :  { %v293_v43 = vmul.f32 %v1027_v38, %v287_v39 }
 0x204   :  { %v297_v48 = vmul.f32 0.5, %v293_v43 }
 0x206   :  { %v298_v61 = vmul.f32 %v297_v48, %v293_v43 }
 0x208   :  { %v303_v8 = vadd.f32 %v302_v62, %v298_v61 }
 0x20a   :  { %v305_v10 = vsel %vm304_vm7, %v303_v8, 0.0 }
 0x2b5   :  { %v905_v46 = vpop.f32.mrb[2].mxu0 }
 0x2b6   :  { %v692_v51 = vmul.f32 %v905_v46, %v905_v46  ;;  %731 = vst [vmem:[%s1222_s6 + $0x8] sm:$0xff] %v905_v46  ;;  %v658_v52 = vpop.f32.mrb[3].mxu0  ;;  %v688_v59 = vmul.f32 %v905_v46, %v684_v50 }
 0x2b7   :  { %v691_v56 = vmul.f32 %v658_v52, %v658_v52  ;;  %730 = vst [vmem:[%s1222_s6] sm:$0xff] %v658_v52  ;;  %v687_v63 = vmul.f32 %v683_v53, %v658_v52 }
 0x2b8   :  { %v699_v60 = vmul.f32 %v697_v54, %v692_v51 }
 0x2b9   :  { %v698_v0 = vmul.f32 %v697_v54, %v691_v56 }
 0x2ba   :  { %v702_v2 = vadd.f32 %v699_v60, %v688_v59 }
 0x2bb   :  { %v701_v7 = vadd.f32 %v698_v0, %v687_v63 }
 0x2bc   :  { %706 = vadd.xlane.f32.xlu0 %v702_v2 }
 0x2bd   :  { %704 = vadd.xlane.f32.xlu1 %v701_v7 }
 0x2c0   :  { %708 = vadd.xlane.f32.xlu0 %v703_v9 }
 0x2c1   :  { %306 = vadd.xlane.f32.xlu1 %v305_v10 }
 0x349   :  { %v707_v11 = vpop.xlane.xlu0 %706 }
 0x34a   :  { %v705_v12 = vpop.xlane.xlu1 %704 }
 0x34b   :  { %v710_v4 = vadd.f32 %v707_v11, %v705_v12 }
 0x34d   :  { %v709_v5 = vpop.xlane.xlu0 %708 }
 0x34e   :  { %v711_v13 = vadd.f32 %v710_v4, %v709_v5  ;;  %v307_v1 = vpop.xlane.xlu1 %306 }
 0x34f   :  { %v308_v14 = vrot.slane %v307_v1, 4 }
 0x350   :  { %v712_v15 = vrot.slane %v711_v13, 4 }
 0x351   :  { %v309_v16 = vadd.f32 %v308_v14, %v307_v1 }
 0x352   :  { %v713_v17 = vadd.f32 %v712_v15, %v711_v13 }
 0x353   :  { %v310_v18 = vrot.slane %v309_v16, 2 }
 0x354   :  { %v714_v19 = vrot.slane %v713_v17, 2 }
 0x355   :  { %v311_v20 = vadd.f32 %v310_v18, %v309_v16 }
 0x356   :  { %v715_v21 = vadd.f32 %v714_v19, %v713_v17 }
 0x357   :  { %v312_v23 = vrot.slane %v311_v20, 1 }
 0x358   :  { %v716_v24 = vrot.slane %v715_v21, 1 }
 0x359   :  { %v313_v25 = vadd.f32 %v312_v23, %v311_v20 }
 0x35a   :  { %v717_v26 = vadd.f32 %v716_v24, %v715_v21 }
 0x35c   :  { %v718_v27 = vadd.f32 %v717_v26, %v313_v25 }
 0x35e   :  { %v726_v28 = vsel %vm723_vm8, %v718_v27, 0.0 }
 0x35f   :  { %v729_v29 = vadd.f32 %v726_v28, %v682_v47 }
 0x361   :  { %732 = vst [vmem:[%s1222_s6 + $0x10] sm:$0xff] %v729_v29 }
 0x362   :  { %737 = vsyncpa [#allocation3], 1 }

</bundles_post_ra>
